<compile_context>
chip_gen: v7x
topology: tpu7x:2x2x1
jax: 0.10.0
libtpu: 0.0.40
codegen_flags: <defaults>
</compile_context>

<pallas_src>
import functools

import jax
import jax.numpy as jnp
from jax.experimental import pallas as pl
from jax.experimental.pallas import tpu as pltpu


def _divisors(n):
  return [d for d in range(1, n + 1) if n % d == 0]


def _pick_divisor(n, target, pred):
  cands = [d for d in _divisors(n) if d <= target and pred(d)]
  return max(cands) if cands else None


def _tpu_config():
  """Best-effort hardware introspection: (vmem_capacity, narrow_mxu, two_cores)."""
  kind = ""
  try:
    kind = jax.devices()[0].device_kind.lower()
  except Exception:
    pass
  vmem_cap = None
  try:
    vmem_cap = int(pltpu.get_tpu_info().vmem_capacity_bytes)
  except Exception:
    vmem_cap = None
  if vmem_cap is None:
    # v5e/v6e have 128 MiB VMEM per core; be conservative (64 MiB) otherwise.
    vmem_cap = (128 << 20) if ("v5" in kind or "v6" in kind) else (64 << 20)
  narrow_mxu = any(t in kind for t in ("v2", "v3", "v4", "v5"))  # 128-wide MXU
  two_cores = "v7" in kind                                        # 2 TCs / chip
  return vmem_cap, narrow_mxu, two_cores


def _ppi_kernel(chunk_ref, nact_ref, x_ref, w_ref, maskj_ref, colorj_ref,
                mask_i_ref, color_i_ref, out_ref, acc_ref, *,
                min_prob, jc, ni, nj, use_hilo):
  """One (batch b, row-tile i, column-chunk slot c) grid step.

  chunk_ref:   SMEM [B*NI*NJ] int32  compacted active-chunk index per slot.
  nact_ref:    SMEM [B*NI]    int32  number of active chunks per row tile.
  x_ref:       (TL, JC*NB)    lane-dense distogram logits, cols ordered (j, bin).
  w_ref:       (JC*NB, 2*JC)  block-diagonal {bin_mask | ones} weights (bf16, resident).
  maskj_ref:   (NJ, 1, JC)    seq_mask  column table for this batch (resident).
  colorj_ref:  (NJ, 1, JC)    seq_color column table for this batch (resident).
  mask_i_ref:  (TL, 1)        seq_mask  for this row tile (resident over c).
  color_i_ref: (TL, 1)        seq_color for this row tile (resident over c).
  out_ref:     (TL, 1)        per-residue cross-chain contact prob (written at last c).
  acc_ref:     (TL, 1) f32    running sum_j log(1 - p_ij) across column chunks.
  """
  b = pl.program_id(0)
  i = pl.program_id(1)
  c = pl.program_id(2)

  @pl.when(c == 0)
  def _():
    acc_ref[...] = jnp.zeros_like(acc_ref)

  row = b * ni + i
  n_active = nact_ref[row]

  @pl.when(c < n_active)
  def _():
    chunk = chunk_ref[row * nj + c]

    # ---- softmax over bins, fully lane-dense -----------------------------------
    x = x_ref[...].astype(jnp.float32)                # [TL, JC*NB]
    m = jnp.max(x, axis=-1, keepdims=True)            # one max per (row, chunk):
    e = jnp.exp(x - m)                                # num/den ratio is shift-invariant

    w = w_ref[...]
    if use_hilo:
      # bf16 hi/lo split keeps the MXU bin reduction at ~f32 accuracy.
      e_hi = e.astype(jnp.bfloat16)
      e_lo = (e - e_hi.astype(jnp.float32)).astype(jnp.bfloat16)
      nd = (jnp.dot(e_hi, w, preferred_element_type=jnp.float32) +
            jnp.dot(e_lo, w, preferred_element_type=jnp.float32))   # [TL, 2*JC]
    else:
      nd = jnp.dot(e.astype(jnp.bfloat16), w, preferred_element_type=jnp.float32)

    num = nd[:, :jc]                                  # sum over bins <= cutoff
    den = jnp.maximum(nd[:, jc:], 1e-30)              # guard exp-underflow 0/0
    p = jnp.minimum(num / den, 1.0 - 1e-6)            # keep log(1-p) finite

    # ---- exact reference masking: p' = p * mask_i * mask_j * [colors differ] ----
    mask_j = maskj_ref[chunk]                         # [1, JC]  (dynamic major index)
    color_j = colorj_ref[chunk]                       # [1, JC]
    mask_i = mask_i_ref[...]                          # [TL, 1]
    color_i = color_i_ref[...]                        # [TL, 1]
    p = p * mask_i * mask_j * (color_i != color_j).astype(jnp.float32)
    contrib = jnp.where(p > min_prob, jnp.log(1.0 - p), 0.0)
    acc_ref[...] += jnp.sum(contrib, axis=-1, keepdims=True)

  # ---- finalize row result on the last column-chunk slot -------------------------
  @pl.when(c == pl.num_programs(2) - 1)
  def _():
    rowp = 1.0 - jnp.exp(acc_ref[...])
    out_ref[...] = jnp.where(rowp > min_prob, rowp, jnp.zeros_like(rowp))


def ppi_head_forward(logits, breaks, seq_mask, seq_color,
                     contact_cutoff=8.0, min_prob=0.15,
                     row_tile=None, col_tile=None, num_chains=None,
                     high_precision=True):
  """JAX/Pallas equivalent of PPIHead.forward -> dict(probs=[B, n_chains]).

  row_tile / col_tile are optional upper bounds on the tile sizes (mainly for
  tests); by default they are derived from the detected TPU generation.
  """
  B, L, L2, NB = logits.shape
  assert L == L2
  itemsize = jnp.dtype(logits.dtype).itemsize
  sub = {4: 8, 2: 16, 1: 32}.get(itemsize, 8)        # sublane multiple per dtype

  vmem_cap, narrow_mxu, two_cores = _tpu_config()
  big_vmem = vmem_cap >= (100 << 20)
  target_blk_f32 = (8 << 20) if big_vmem else (4 << 20)   # f32-equivalent block size

  # ---- column chunk: 2*jc should match the native MXU width; lane legality ------
  jc_target = col_tile if col_tile is not None else (64 if narrow_mxu else 128)
  jc = _pick_divisor(L, jc_target, lambda d: (d * NB) % 128 == 0)
  if jc is None:
    jc = L                                            # full-row chunk is always legal
  nj = L // jc

  # ---- row tile: grow toward the f32-equivalent block-byte target ---------------
  if row_tile is not None:
    tl_target = row_tile
  else:
    tl_target = max(target_blk_f32 // (jc * NB * 4), sub)
  tl = _pick_divisor(L, min(tl_target, L), lambda d: d % sub == 0)
  if tl is None:
    tl = L                                            # full dim is always legal
  if two_cores:                                       # occupancy shrink only on 2-TC parts
    while B * (L // tl) < 2 and tl > sub:
      smaller = _pick_divisor(L, tl // 2, lambda d: d % sub == 0)
      if smaller is None or smaller >= tl:
        break
      tl = smaller
  ni = L // tl

  # ---- bin mask and block-diagonal reduction weights (bf16, values are 0/1) -----
  t = jnp.sum((breaks <= contact_cutoff).astype(jnp.int32))
  bin_mask = (jnp.arange(NB) <= t).astype(jnp.float32)           # bins 0..t inclusive
  eye = jnp.eye(jc, dtype=jnp.float32)
  w_num = (eye[:, None, :] * bin_mask[None, :, None]).reshape(jc * NB, jc)
  w_den = jnp.broadcast_to(eye[:, None, :], (jc, NB, jc)).reshape(jc * NB, jc)
  w = jnp.concatenate([w_num, w_den], axis=-1).astype(jnp.bfloat16)  # [jc*NB, 2*jc]

  # ---- array views (cheap reshapes) ----------------------------------------------
  lflat = logits.reshape(B, L, L * NB)                # lane-dense (j, bin) minor axis
  maskf = seq_mask.astype(jnp.float32)
  colorf = seq_color.astype(jnp.float32)
  maskrows = maskf.reshape(B, nj, 1, jc)              # resident column tables
  colorrows = colorf.reshape(B, nj, 1, jc)
  mask_i = maskf[:, :, None]                          # [B, L, 1]
  color_i = colorf[:, :, None]

  # ---- block sparsity: compact active column chunks per (b, row-tile) ------------
  # A chunk contributes only if it has a pair with different chain ids and a
  # strictly non-zero mask product (exact for any non-negative mask values).
  pair = ((seq_color[:, :, None] != seq_color[:, None, :]) &
          (maskf[:, :, None] * maskf[:, None, :] > 0.0))          # [B, L, L]
  active = pair.reshape(B, ni, tl, nj, jc).any(axis=(2, 4))       # [B, NI, NJ]
  order = jnp.argsort(jnp.logical_not(active).astype(jnp.int32),
                      axis=-1).astype(jnp.int32)                  # active chunks first
  nact = jnp.sum(active, axis=-1).astype(jnp.int32)               # [B, NI]
  last = jnp.take_along_axis(order, jnp.maximum(nact - 1, 0)[..., None], axis=-1)
  cidx = jnp.where(jnp.arange(nj)[None, None, :] < nact[..., None], order, last)
  chunk_flat = cidx.reshape(-1).astype(jnp.int32)                 # [B*NI*NJ]
  nact_flat = nact.reshape(-1)                                    # [B*NI]

  # ---- VMEM budget from the true footprint ---------------------------------------
  blk_in = tl * jc * NB * itemsize
  blk_f32 = tl * jc * NB * 4
  w_bytes = (jc * NB) * (2 * jc) * 2
  cap = (96 << 20) if big_vmem else (48 << 20)
  footprint = 2 * blk_in + int(3.5 * blk_f32) + 2 * w_bytes + (6 << 20)
  vmem_limit = int(min(max(footprint, 24 << 20), cap))

  kernel = functools.partial(_ppi_kernel, min_prob=float(min_prob), jc=jc,
                             ni=ni, nj=nj, use_hilo=bool(high_precision))
  per_res = pl.pallas_call(
      kernel,
      out_shape=jax.ShapeDtypeStruct((B, L, 1), jnp.float32),
      grid_spec=pltpu.PrefetchScalarGridSpec(
          num_scalar_prefetch=2,
          grid=(B, ni, nj),
          in_specs=[
              # logits chunk; data-dependent column-chunk index from SMEM.
              pl.BlockSpec((None, tl, jc * NB),
                           lambda b, i, c, ck, na: (b, i, ck[(b * ni + i) * nj + c])),
              # W, resident.
              pl.BlockSpec((jc * NB, 2 * jc), lambda b, i, c, ck, na: (0, 0)),
              # mask / color column tables, resident per batch.
              pl.BlockSpec((None, nj, 1, jc), lambda b, i, c, ck, na: (b, 0, 0, 0)),
              pl.BlockSpec((None, nj, 1, jc), lambda b, i, c, ck, na: (b, 0, 0, 0)),
              # mask / color row columns, resident over the reduction axis.
              pl.BlockSpec((None, tl, 1), lambda b, i, c, ck, na: (b, i, 0)),
              pl.BlockSpec((None, tl, 1), lambda b, i, c, ck, na: (b, i, 0)),
          ],
          out_specs=pl.BlockSpec((None, tl, 1), lambda b, i, c, ck, na: (b, i, 0)),
          scratch_shapes=[pltpu.VMEM((tl, 1), jnp.float32)],
      ),
      compiler_params=pltpu.CompilerParams(
          dimension_semantics=("parallel", "parallel", "arbitrary"),
          vmem_limit_bytes=vmem_limit),
  )(chunk_flat, nact_flat, lflat, w, maskrows, colorrows, mask_i, color_i)

  per_res = per_res[..., 0]                           # [B, L]

  # Per-chain aggregation (torch.scatter_add over chain ids).  Output width is
  # data-dependent; pass num_chains explicitly to stay jit-friendly.
  if num_chains is None:
    num_chains = int(jax.device_get(jnp.max(seq_color)))   # host sync if not given
  onehot = jax.nn.one_hot(seq_color.astype(jnp.int32) - 1, num_chains,
                          dtype=jnp.float32)               # [B, L, n]
  log_keep = jnp.log1p(-jnp.minimum(per_res, 1.0 - 1e-7))
  s = jnp.sum(log_keep[:, :, None] * onehot, axis=1)       # exact f32, no matmul
  probs = 1.0 - jnp.exp(s)
  return dict(probs=probs)


def _ppi_ref(logits, breaks, seq_mask, seq_color, contact_cutoff, min_prob):
  """Pure-JAX reference mirroring the PyTorch forward, for verification."""
  probs = jax.nn.softmax(logits, axis=-1)
  t = jnp.sum(breaks <= contact_cutoff)
  nb = logits.shape[-1]
  probs = jnp.sum(jnp.where(jnp.arange(nb) <= t, probs, 0.0), axis=-1)
  crd = seq_mask[..., None] * seq_mask[..., None, :]
  clr = (seq_color[..., None] != seq_color[..., None, :]).astype(probs.dtype)
  probs = probs * clr * crd
  probs = jnp.where(probs > min_prob, probs, 0.0)
  probs = 1.0 - jnp.exp(jnp.sum(jnp.log(1.0 - probs), axis=-1))
  probs = jnp.where(probs > min_prob, probs, 0.0)
  n = int(jnp.max(seq_color))
  onehot = jax.nn.one_hot(seq_color.astype(jnp.int32) - 1, n, dtype=probs.dtype)
  s = jnp.sum(jnp.log(1.0 - probs)[:, :, None] * onehot, axis=1)
  return 1.0 - jnp.exp(s)


def _run_case(key, B, L, NB, n_chains, row_tile, col_tile):
  k1, _ = jax.random.split(key)
  logits = jax.random.normal(k1, (B, L, L, NB), dtype=jnp.float32)
  breaks = jnp.linspace(2.0, 22.0, NB - 1).astype(jnp.float32)
  seq_mask = jnp.ones((B, L), jnp.float32).at[0, L - 1].set(0.0).at[1, 0].set(0.0)
  sizes = [L // n_chains] * (n_chains - 1)
  sizes.append(L - sum(sizes))
  seq_color = jnp.concatenate(
      [jnp.full((B, sz), i + 1, jnp.int32) for i, sz in enumerate(sizes)], axis=-1)

  out = ppi_head_forward(logits, breaks, seq_mask, seq_color,
                         contact_cutoff=8.0, min_prob=0.15,
                         row_tile=row_tile, col_tile=col_tile,
                         num_chains=n_chains)
  probs = jax.block_until_ready(out["probs"])
  ref = _ppi_ref(logits, breaks, seq_mask, seq_color, 8.0, 0.15)
  assert probs.shape == ref.shape
  # Tolerance 1e-4: the bf16 hi/lo MXU reduction carries ~1e-5-level relative error
  # on the per-pair probabilities, slightly amplified through the log/exp chain.
  assert jnp.allclose(probs, ref, atol=1e-4, rtol=1e-4), (probs, ref)


if __name__ == "__main__":
  key = jax.random.PRNGKey(0)
  k_a, k_b = jax.random.split(key)
  # Auto-tiled small case (single column chunk, hardware-derived tiles).
  _run_case(k_a, B=2, L=16, NB=16, n_chains=2, row_tile=None, col_tile=None)
  # Multi row-tile / multi column-chunk case: exercises the reduction pipeline,
  # the sparsity skip (intra-chain chunks) and the clamped trailing slots.
  _run_case(k_b, B=2, L=32, NB=16, n_chains=3, row_tile=8, col_tile=8)
  print("KERNEL_OK")
</pallas_src>

<mosaic_0001>
module attributes {stable_mosaic.version = 11 : i64} {
  func.func @_ppi_kernel(%arg0: i32, %arg1: i32, %arg2: i32, %arg3: memref<2xi32, #tpu.memory_space<smem>>, %arg4: memref<2xi32, #tpu.memory_space<smem>>, %arg5: memref<1x16x256xf32, #tpu.memory_space<vmem>>, %arg6: memref<256x32xbf16, #tpu.memory_space<vmem>>, %arg7: memref<1x1x1x16xf32, #tpu.memory_space<vmem>>, %arg8: memref<1x1x1x16xf32, #tpu.memory_space<vmem>>, %arg9: memref<1x16x1xf32, #tpu.memory_space<vmem>>, %arg10: memref<1x16x1xf32, #tpu.memory_space<vmem>>, %arg11: memref<1x16x1xf32, #tpu.memory_space<vmem>>, %arg12: memref<16x1xf32, #tpu.memory_space<vmem>>) attributes {dimension_semantics = [#tpu.dimension_semantics<parallel>, #tpu.dimension_semantics<parallel>, #tpu.dimension_semantics<arbitrary>], iteration_bounds = array<i64: 2, 1, 1>, scalar_prefetch = 2 : i64, scratch_operands = 1 : i64, tpu.core_type = #tpu.core_type<tc>, window_params = [{transform_indices = @transform_0, window_bounds = array<i64: 1, 16, 256>}, {pipeline_mode = #tpu.pipeline_mode<synchronous>, transform_indices = @transform_1, window_bounds = array<i64: 256, 32>}, {transform_indices = @transform_2, window_bounds = array<i64: 1, 1, 1, 16>}, {transform_indices = @transform_3, window_bounds = array<i64: 1, 1, 1, 16>}, {transform_indices = @transform_4, window_bounds = array<i64: 1, 16, 1>}, {transform_indices = @transform_5, window_bounds = array<i64: 1, 16, 1>}, {transform_indices = @transform_6, window_bounds = array<i64: 1, 16, 1>}]} {
    %c0_i32 = arith.constant 0 : i32
    %0 = arith.cmpi eq, %arg2, %c0_i32 : i32
    %1 = arith.extui %0 : i1 to i32
    %c0_i32_0 = arith.constant 0 : i32
    %2 = arith.cmpi ne, %1, %c0_i32_0 : i32
    scf.if %2 {
      %cst = arith.constant 0.000000e+00 : f32
      %13 = vector.broadcast %cst : f32 to vector<16x1xf32>
      %c0 = arith.constant 0 : index
      %c0_4 = arith.constant 0 : index
      %14 = vector.load %arg12[%c0, %c0_4] : memref<16x1xf32, #tpu.memory_space<vmem>>, vector<16x1xf32>
      tpu.vector_store %arg12[%c0, %c0_4], %13 {strides = array<i32>} : memref<16x1xf32, #tpu.memory_space<vmem>>, vector<16x1xf32>,
    } else {
    }
    %c1_i32 = arith.constant 1 : i32
    %3 = arith.muli %arg0, %c1_i32 : i32
    %4 = arith.addi %3, %arg1 : i32
    %5 = arith.index_cast %4 : i32 to index
    %6 = memref.load %arg4[%5] : memref<2xi32, #tpu.memory_space<smem>>
    %7 = arith.cmpi slt, %arg2, %6 : i32
    %8 = arith.extui %7 : i1 to i32
    %c0_i32_1 = arith.constant 0 : i32
    %9 = arith.cmpi ne, %8, %c0_i32_1 : i32
    scf.if %9 {
      %c1_i32_4 = arith.constant 1 : i32
      %13 = arith.muli %4, %c1_i32_4 : i32
      %14 = arith.addi %13, %arg2 : i32
      %15 = arith.index_cast %14 : i32 to index
      %16 = memref.load %arg3[%15] : memref<2xi32, #tpu.memory_space<smem>>
      %c0 = arith.constant 0 : index
      %c0_5 = arith.constant 0 : index
      %c0_6 = arith.constant 0 : index
      %17 = vector.load %arg5[%c0, %c0_5, %c0_6] : memref<1x16x256xf32, #tpu.memory_space<vmem>>, vector<1x16x256xf32>
      %18 = vector.shape_cast %17 : vector<1x16x256xf32> to vector<16x256xf32>
      %cst = arith.constant dense<0xFF800000> : vector<16xf32>
      %19 = vector.multi_reduction <maximumf>, %18, %cst [1] : vector<16x256xf32> to vector<16xf32>
      %20 = vector.shape_cast %19 : vector<16xf32> to vector<16x1xf32>
      %21 = vector.broadcast %20 : vector<16x1xf32> to vector<16x256xf32>
      %22 = arith.subf %18, %21 : vector<16x256xf32>
      %23 = math.exp %22 : vector<16x256xf32>
      %c0_7 = arith.constant 0 : index
      %c0_8 = arith.constant 0 : index
      %24 = vector.load %arg6[%c0_7, %c0_8] : memref<256x32xbf16, #tpu.memory_space<vmem>>, vector<256x32xbf16>
      %25 = arith.truncf %23 : vector<16x256xf32> to vector<16x256xbf16>
      %26 = arith.extf %25 : vector<16x256xbf16> to vector<16x256xf32>
      %27 = arith.subf %23, %26 : vector<16x256xf32>
      %28 = arith.truncf %27 : vector<16x256xf32> to vector<16x256xbf16>
      %cst_9 = arith.constant dense<0.000000e+00> : vector<16x32xf32>
      %29 = tpu.matmul %25, %24, %cst_9 {dimension_numbers = #tpu.dot_dimension_numbers<[1], [0], [0], [1], [0, 0, 1, 1], [], []>} : vector<16x256xbf16>, vector<256x32xbf16>, vector<16x32xf32> -> vector<16x32xf32>
      %cst_10 = arith.constant dense<0.000000e+00> : vector<16x32xf32>
      %30 = tpu.matmul %28, %24, %cst_10 {dimension_numbers = #tpu.dot_dimension_numbers<[1], [0], [0], [1], [0, 0, 1, 1], [], []>} : vector<16x256xbf16>, vector<256x32xbf16>, vector<16x32xf32> -> vector<16x32xf32>
      %31 = arith.addf %29, %30 : vector<16x32xf32>
      %32 = vector.extract_strided_slice %31 {offsets = [0, 0], sizes = [16, 16], strides = [1, 1]} : vector<16x32xf32> to vector<16x16xf32>
      %33 = vector.extract_strided_slice %31 {offsets = [0, 16], sizes = [16, 16], strides = [1, 1]} : vector<16x32xf32> to vector<16x16xf32>
      %cst_11 = arith.constant 1.000000e-30 : f32
      %34 = vector.broadcast %cst_11 : f32 to vector<16x16xf32>
      %35 = arith.maximumf %33, %34 : vector<16x16xf32>
      %36 = arith.divf %32, %35 : vector<16x16xf32>
      %cst_12 = arith.constant 0.999998986 : f32
      %37 = vector.broadcast %cst_12 : f32 to vector<16x16xf32>
      %38 = arith.minimumf %36, %37 : vector<16x16xf32>
      %c0_13 = arith.constant 0 : index
      %39 = arith.index_cast %16 : i32 to index
      %c0_14 = arith.constant 0 : index
      %c0_15 = arith.constant 0 : index
      %40 = vector.load %arg7[%c0_13, %39, %c0_14, %c0_15] : memref<1x1x1x16xf32, #tpu.memory_space<vmem>>, vector<1x1x1x16xf32>
      %41 = vector.shape_cast %40 : vector<1x1x1x16xf32> to vector<1x16xf32>
      %c0_16 = arith.constant 0 : index
      %42 = arith.index_cast %16 : i32 to index
      %c0_17 = arith.constant 0 : index
      %c0_18 = arith.constant 0 : index
      %43 = vector.load %arg8[%c0_16, %42, %c0_17, %c0_18] : memref<1x1x1x16xf32, #tpu.memory_space<vmem>>, vector<1x1x1x16xf32>
      %44 = vector.shape_cast %43 : vector<1x1x1x16xf32> to vector<1x16xf32>
      %c0_19 = arith.constant 0 : index
      %c0_20 = arith.constant 0 : index
      %c0_21 = arith.constant 0 : index
      %45 = vector.load %arg9[%c0_19, %c0_20, %c0_21] : memref<1x16x1xf32, #tpu.memory_space<vmem>>, vector<1x16x1xf32>
      %46 = vector.shape_cast %45 : vector<1x16x1xf32> to vector<16x1xf32>
      %c0_22 = arith.constant 0 : index
      %c0_23 = arith.constant 0 : index
      %c0_24 = arith.constant 0 : index
      %47 = vector.load %arg10[%c0_22, %c0_23, %c0_24] : memref<1x16x1xf32, #tpu.memory_space<vmem>>, vector<1x16x1xf32>
      %48 = vector.shape_cast %47 : vector<1x16x1xf32> to vector<16x1xf32>
      %49 = vector.broadcast %46 : vector<16x1xf32> to vector<16x16xf32>
      %50 = arith.mulf %38, %49 : vector<16x16xf32>
      %51 = vector.broadcast %41 : vector<1x16xf32> to vector<16x16xf32>
      %52 = arith.mulf %50, %51 : vector<16x16xf32>
      %53 = vector.broadcast %48 : vector<16x1xf32> to vector<16x16xf32>
      %54 = vector.broadcast %44 : vector<1x16xf32> to vector<16x16xf32>
      %55 = arith.cmpf one, %53, %54 : vector<16x16xf32>
      %56 = arith.extui %55 : vector<16x16xi1> to vector<16x16xi32>
      %57 = arith.sitofp %56 : vector<16x16xi32> to vector<16x16xf32>
      %58 = arith.mulf %52, %57 : vector<16x16xf32>
      %cst_25 = arith.constant 1.500000e-01 : f32
      %59 = vector.broadcast %cst_25 : f32 to vector<16x16xf32>
      %60 = arith.cmpf ogt, %58, %59 : vector<16x16xf32>
      %cst_26 = arith.constant 1.000000e+00 : f32
      %61 = vector.broadcast %cst_26 : f32 to vector<16x16xf32>
      %62 = arith.subf %61, %58 : vector<16x16xf32>
      %63 = math.log %62 : vector<16x16xf32>
      %cst_27 = arith.constant 0.000000e+00 : f32
      %64 = vector.broadcast %cst_27 : f32 to vector<16x16xf32>
      %65 = arith.select %60, %63, %64 : vector<16x16xi1>, vector<16x16xf32>
      %c0_28 = arith.constant 0 : index
      %c0_29 = arith.constant 0 : index
      %66 = vector.load %arg12[%c0_28, %c0_29] : memref<16x1xf32, #tpu.memory_space<vmem>>, vector<16x1xf32>
      %cst_30 = arith.constant dense<0.000000e+00> : vector<16xf32>
      %67 = vector.multi_reduction <add>, %65, %cst_30 [1] : vector<16x16xf32> to vector<16xf32>
      %68 = vector.shape_cast %67 : vector<16xf32> to vector<16x1xf32>
      %69 = arith.addf %66, %68 : vector<16x1xf32>
      %c0_31 = arith.constant 0 : index
      %c0_32 = arith.constant 0 : index
      %70 = vector.load %arg12[%c0_31, %c0_32] : memref<16x1xf32, #tpu.memory_space<vmem>>, vector<16x1xf32>
      tpu.vector_store %arg12[%c0_31, %c0_32], %69 {strides = array<i32>} : memref<16x1xf32, #tpu.memory_space<vmem>>, vector<16x1xf32>,
    } else {
    }
    %c0_i32_2 = arith.constant 0 : i32
    %10 = arith.cmpi eq, %arg2, %c0_i32_2 : i32
    %11 = arith.extui %10 : i1 to i32
    %c0_i32_3 = arith.constant 0 : i32
    %12 = arith.cmpi ne, %11, %c0_i32_3 : i32
    scf.if %12 {
      %c0 = arith.constant 0 : index
      %c0_4 = arith.constant 0 : index
      %13 = vector.load %arg12[%c0, %c0_4] : memref<16x1xf32, #tpu.memory_space<vmem>>, vector<16x1xf32>
      %14 = math.exp %13 : vector<16x1xf32>
      %cst = arith.constant 1.000000e+00 : f32
      %15 = vector.broadcast %cst : f32 to vector<16x1xf32>
      %16 = arith.subf %15, %14 : vector<16x1xf32>
      %cst_5 = arith.constant 1.500000e-01 : f32
      %17 = vector.broadcast %cst_5 : f32 to vector<16x1xf32>
      %18 = arith.cmpf ogt, %16, %17 : vector<16x1xf32>
      %cst_6 = arith.constant 0.000000e+00 : f32
      %19 = vector.broadcast %cst_6 : f32 to vector<16x1xf32>
      %20 = arith.select %18, %16, %19 : vector<16x1xi1>, vector<16x1xf32>
      %c0_7 = arith.constant 0 : index
      %c0_8 = arith.constant 0 : index
      %c0_9 = arith.constant 0 : index
      %21 = vector.load %arg11[%c0_7, %c0_8, %c0_9] : memref<1x16x1xf32, #tpu.memory_space<vmem>>, vector<1x16x1xf32>
      %22 = vector.shape_cast %21 : vector<1x16x1xf32> to vector<16x1xf32>
      %23 = vector.shape_cast %20 : vector<16x1xf32> to vector<1x16x1xf32>
      tpu.vector_store %arg11[%c0_7, %c0_8, %c0_9], %23 {strides = array<i32>} : memref<1x16x1xf32, #tpu.memory_space<vmem>>, vector<1x16x1xf32>,
    } else {
    }
    return
  }
  func.func @transform_0(%arg0: i32, %arg1: i32, %arg2: i32, %arg3: memref<2xi32, #tpu.memory_space<smem>>, %arg4: memref<2xi32, #tpu.memory_space<smem>>) -> (i32, i32, i32) {
    %c1_i32 = arith.constant 1 : i32
    %0 = arith.muli %arg0, %c1_i32 : i32
    %1 = arith.addi %0, %arg1 : i32
    %c1_i32_0 = arith.constant 1 : i32
    %2 = arith.muli %1, %c1_i32_0 : i32
    %3 = arith.addi %2, %arg2 : i32
    %4 = arith.index_cast %3 : i32 to index
    %5 = memref.load %arg3[%4] : memref<2xi32, #tpu.memory_space<smem>>
    %c0_i32 = arith.constant 0 : i32
    return %arg0, %arg1, %5 : i32, i32, i32
  }
  func.func @transform_1(%arg0: i32, %arg1: i32, %arg2: i32, %arg3: memref<2xi32, #tpu.memory_space<smem>>, %arg4: memref<2xi32, #tpu.memory_space<smem>>) -> (i32, i32) {
    %c0_i32 = arith.constant 0 : i32
    %c0_i32_0 = arith.constant 0 : i32
    %c0_i32_1 = arith.constant 0 : i32
    return %c0_i32, %c0_i32_0 : i32, i32
  }
  func.func @transform_2(%arg0: i32, %arg1: i32, %arg2: i32, %arg3: memref<2xi32, #tpu.memory_space<smem>>, %arg4: memref<2xi32, #tpu.memory_space<smem>>) -> (i32, i32, i32, i32) {
    %c0_i32 = arith.constant 0 : i32
    %c0_i32_0 = arith.constant 0 : i32
    %c0_i32_1 = arith.constant 0 : i32
    %c0_i32_2 = arith.constant 0 : i32
    return %arg0, %c0_i32, %c0_i32_0, %c0_i32_1 : i32, i32, i32, i32
  }
  func.func @transform_3(%arg0: i32, %arg1: i32, %arg2: i32, %arg3: memref<2xi32, #tpu.memory_space<smem>>, %arg4: memref<2xi32, #tpu.memory_space<smem>>) -> (i32, i32, i32, i32) {
    %c0_i32 = arith.constant 0 : i32
    %c0_i32_0 = arith.constant 0 : i32
    %c0_i32_1 = arith.constant 0 : i32
    %c0_i32_2 = arith.constant 0 : i32
    return %arg0, %c0_i32, %c0_i32_0, %c0_i32_1 : i32, i32, i32, i32
  }
  func.func @transform_4(%arg0: i32, %arg1: i32, %arg2: i32, %arg3: memref<2xi32, #tpu.memory_space<smem>>, %arg4: memref<2xi32, #tpu.memory_space<smem>>) -> (i32, i32, i32) {
    %c0_i32 = arith.constant 0 : i32
    %c0_i32_0 = arith.constant 0 : i32
    return %arg0, %arg1, %c0_i32 : i32, i32, i32
  }
  func.func @transform_5(%arg0: i32, %arg1: i32, %arg2: i32, %arg3: memref<2xi32, #tpu.memory_space<smem>>, %arg4: memref<2xi32, #tpu.memory_space<smem>>) -> (i32, i32, i32) {
    %c0_i32 = arith.constant 0 : i32
    %c0_i32_0 = arith.constant 0 : i32
    return %arg0, %arg1, %c0_i32 : i32, i32, i32
  }
  func.func @transform_6(%arg0: i32, %arg1: i32, %arg2: i32, %arg3: memref<2xi32, #tpu.memory_space<smem>>, %arg4: memref<2xi32, #tpu.memory_space<smem>>) -> (i32, i32, i32) {
    %c0_i32 = arith.constant 0 : i32
    %c0_i32_0 = arith.constant 0 : i32
    return %arg0, %arg1, %c0_i32 : i32, i32, i32
  }
}

</mosaic_0001>

<bundles_post_ra>
// kernel: tpu_custom_call.1
= control target key start
LH: loop header
LB: loop body
LE: loop exit
PB: predicated region body
PF: predicated region fallthrough
CT: control target
= control target key end

     0   :  { %s1370_s0 = inlined_call_operand.vmem [shape: s32[2], index: 0, kind: input, shape index: {}]   ;;  %s1371_s2 = inlined_call_operand.vmem [shape: f32[2,16,256], index: 2, kind: input, shape index: {}]   ;;  %s1372_s3 = inlined_call_operand.vmem [shape: bf16[256,32], index: 3, kind: input, shape index: {}]   ;;  %s1373_s4 = inlined_call_operand.vmem [shape: f32[2,1,1,16], index: 4, kind: input, shape index: {}]   ;;  %s1374_s5 = inlined_call_operand.vmem [shape: f32[2,1,1,16], index: 5, kind: input, shape index: {}]   ;;  %s1375_s6 = inlined_call_operand.vmem [shape: f32[2,16,1], index: 6, kind: input, shape index: {}]   ;;  %s1376_s7 = inlined_call_operand.vmem [shape: f32[2,16,1], index: 7, kind: input, shape index: {}]   ;;  %s1377_s8 = inlined_call_operand.vmem [shape: f32[2,16,1], index: 8, kind: output, shape index: {}]   ;;  %s1378_s1 = inlined_call_operand.vmem [shape: s32[2], index: 1, kind: input, shape index: {}]  }
   0x1   :  { %s13_s29 = sshll.u32 %s1370_s0, 4  ;;  %s17_s10 = sshll.u32 %s1378_s1, 4  ;;  %s14_s29 = int_to_ptr.vmem [resolvable:$true] %s13_s29  ;;  %s18_s10 = int_to_ptr.vmem [resolvable:$true] %s17_s10 }
   0x2   :  { %s1125_s11 = scalar_lea.vmem %s14_s29, 16  ;;  %p1130_p1 = scmp.lt.s32.totalorder %s14_s29, %s14_s29 }
   0x3   :  { %p1126_p0 = scmp.ne.s32.totalorder %s14_s29, %s1125_s11  ;;  %p1131_p2 = scmp.lt.s32.totalorder %s1125_s11, %s1125_s11 }
   0x5   :  { %p1132_p3 = por %p1131_p2, %p1130_p1 }
   0x7   :  { %p1133_p4 = pnand %p1132_p3, %p1126_p0 }
   0x9   :  { %1136 = shalt.err (!%p1133_p4)  }
   0xa   :  { %s1175_s12 = smov [#allocation4]   ;;  %s1137_s13 = scalar_lea.vmem %s18_s10, 16 }
   0xb   :  { %16 = dma.vmem_to_smem %s14_s29, 16, %s1175_s12, [#allocation3] }
   0xc   :  { %p1138_p5 = scmp.ne.s32.totalorder %s18_s10, %s1137_s13  ;;  %p1142_p6 = scmp.lt.s32.totalorder %s18_s10, %s18_s10 }
   0xd   :  { %p1143_p7 = scmp.lt.s32.totalorder %s1137_s13, %s1137_s13 }
   0xf   :  { %p1144_p8 = por %p1143_p7, %p1142_p6 }
  0x11   :  { %p1145_p9 = pnand %p1144_p8, %p1138_p5 }
  0x13   :  { %1148 = shalt.err (!%p1145_p9)  }
  0x14   :  { %s1176_s0 = smov [#allocation5]  }
  0x15   :  { %20 = dma.vmem_to_smem %s18_s10, 16, %s1176_s0, [#allocation3] }
  0x16   :  { %1161 = dma.done.wait [#allocation3], 32 }
  0x17   :  { %1162 = vsyncadd [#allocation3], 4294967264 }
  0x18   :  { %22 = sfence }
  0x19   :  { %s1232_s1 = smov 0   ;;  %s1234_s14 = smov 0  }
  0x1a   :  { %s1236_s15 = smov 0  }
  0x1b LB: > { %s47_s16 = sadd.s32 1, %s1169_s14  ;;  %p976_p10 = scmp.ge.s32.totalorder %s1173_s15, 1  ;;  %s1173_s15 = sphi %s1236_s15, %s28_s15   ;;  %s1169_s14 = sphi %s1234_s14, %s1380_s14   ;;  %s1165_s1 = sphi %s1232_s1, %s1379_s1  }
  0x1c   : > { %p49_p11 = scmp.ge.s32.totalorder %s47_s16, 2  ;;  %p322_p12 = scmp.lt.s32.totalorder %s1173_s15, 3 }
  0x1e   : > { %s1382_s16 = smov (%p49_p11, %s47_s16), 0  ;;  %p323_p13 = pnand %p976_p10, %p322_p12 }
  0x1f   : > { %s394_s17 = sld [smem:[#allocation4 + %s1165_s1]] (!%p323_p13)  ;;  %p397_p0 = scmp.lt.s32.totalorder (!%p323_p13), %s1165_s1, 1  ;;  %vm455_vm0 = vcmask (!%p323_p13), 7168   ;;  %v1177_v0 = vmov (!%p323_p13), 0.0  }
  0x20   : > { %326 = sbr.rel (%p323_p13) target bundleno = 775 (0x307), region = 44  ;;  %456 = vst.msk [vmem:[#allocation2] sm:$0xff] (!%p323_p13), %vm455_vm0, %v1177_v0  ;;  %457 = vst.msk [vmem:[#allocation2 + $0x8] sm:$0xff] (!%p323_p13), %vm455_vm0, %v1177_v0  ;;  %s459_s18 = sld [smem:[#allocation5 + %s1165_s1]] (!%p323_p13) }
  0x25   : > { %s977_s27 = sshll.u32 (!%p323_p13), %s394_s17, 1 }
  0x26   : > { %p401_p1 = scmp.lt.s32.totalorder (!%p323_p13), %s977_s27, 1  ;;  %p987_p2 = scmp.le.s32.totalorder (!%p323_p13), %s459_s18, 0 }
  0x27   : > { %s1258_s19 = scalar_select %p397_p0, %s1165_s1, 1 }
  0x28   : > { %s1384_s27 = smov (!%p401_p1, %s977_s27), 1  ;;  %463 = sbr.rel (%p987_p2) target bundleno = 750 (0x2ee), region = 52 }
  0x29   : > { %s416_s22 = scalar_lea.vmem %s1373_s4, %s1258_s19  ;;  %s419_s25 = scalar_lea.vmem %s1374_s5, %s1258_s19  ;;  %v1089_v6 = vld [vmem:[%s1372_s3 + $0x40] sm:$0xff] (!%p987_p2)   ;;  %v1091_v9 = vld [vmem:[%s1372_s3 + $0x48] sm:$0xff] (!%p987_p2)   ;;  %v1093_v11 = vld [vmem:[%s1372_s3 + $0x50] sm:$0xff] (!%p987_p2)   ;;  %v1178_v50 = vmov (!%p987_p2), 0   ;;  %vm790_vm3 = vcmask (!%p987_p2), 130048  }
  0x2a   : > { %s1010_s26 = sshll.u32 %s1258_s19, 4  ;;  %s978_s12 = sshll.u32 %s1258_s19, 2  ;;  %v1090_v8 = vld [vmem:[%s1372_s3] sm:$0xff] (!%p987_p2)   ;;  %1035 = vmatprep.subr.bf16.mxu1 (!%p987_p2), %v1089_v6  ;;  %1013 = vmatprep.subr.bf16.mxu0 (!%p987_p2), %v1089_v6  ;;  %v1092_v10 = vld [vmem:[%s1372_s3 + $0x8] sm:$0xff] (!%p987_p2)   ;;  %v1094_v12 = vld [vmem:[%s1372_s3 + $0x10] sm:$0xff] (!%p987_p2)  }
  0x2b   : > { %s1272_s30 = scalar_lea.vmem %s1375_s6, %s1010_s26  ;;  %s1277_s11 = scalar_lea.vmem %s1376_s7, %s1010_s26  ;;  %1036 = vmatpush3.bf16.msra.mxu1 (!%p987_p2), %v1090_v8  ;;  %1014 = vmatpush3.bf16.msra.mxu0 (!%p987_p2), %v1090_v8  ;;  %v1095_v13 = vld [vmem:[%s1372_s3 + $0x58] sm:$0xff] (!%p987_p2)   ;;  %v1097_v15 = vld [vmem:[%s1372_s3 + $0x60] sm:$0xff] (!%p987_p2)   ;;  %v1099_v17 = vld [vmem:[%s1372_s3 + $0x68] sm:$0xff] (!%p987_p2)  }
  0x2c   : > { %s1283_s20 = scalar_lea.vmem %s1377_s8, %s1010_s26  ;;  %s406_s21 = sadd.s32 %s978_s12, %s1384_s27  ;;  %1037 = vmatprep.subr.bf16.mxu1 (!%p987_p2), %v1091_v9  ;;  %1015 = vmatprep.subr.bf16.mxu0 (!%p987_p2), %v1091_v9  ;;  %v1096_v14 = vld [vmem:[%s1372_s3 + $0x18] sm:$0xff] (!%p987_p2)   ;;  %v1098_v16 = vld [vmem:[%s1372_s3 + $0x20] sm:$0xff] (!%p987_p2)   ;;  %v1100_v18 = vld [vmem:[%s1372_s3 + $0x28] sm:$0xff] (!%p987_p2)  }
  0x2d   : > { %s979_s17 = sshll.u32 %s406_s21, 3  ;;  %v1101_v19 = vld [vmem:[%s1372_s3 + $0x70] sm:$0xff] (!%p987_p2)   ;;  %v1103_v21 = vld [vmem:[%s1372_s3 + $0x78] sm:$0xff] (!%p987_p2)   ;;  %v730_v49 = vld [vmem:[%s1272_s30] sm:$0xff] (!%p987_p2)  ;;  %1087 = vset.pattern.permute.xlu0 (!%p987_p2), %v1178_v50  ;;  %1088 = vset.pattern.permute.xlu1 (!%p987_p2), %v1178_v50  ;;  %s1179_s18 = smov (!%p987_p2), 112  }
  0x2e   : > { %s408_s28 = scalar_lea.vmem %s1371_s2, %s979_s17  ;;  %v1102_v20 = vld [vmem:[%s1372_s3 + $0x30] sm:$0xff] (!%p987_p2)   ;;  %v1104_v22 = vld [vmem:[%s1372_s3 + $0x38] sm:$0xff] (!%p987_p2)   ;;  %s465_s10 = sld [smem:[#allocation4 + %s1165_s1]] (!%p987_p2) }
  0x2f   : > { %v466_v1 = vld [vmem:[%s408_s28] sm:$0xff]  ;;  %v467_v2 = vld [vmem:[%s408_s28 + $0x8] sm:$0xff]  ;;  %v1288_v3 = vld [vmem:[%s408_s28 + $0x10] sm:$0xff]  ;;  %1038 = vmatpush3.bf16.msra.mxu1 %v1092_v10  ;;  %1016 = vmatpush3.bf16.msra.mxu0 %v1092_v10 }
  0x30   : > { %v470_v4 = vmax.f32 %v466_v1, %v467_v2  ;;  %v469_v5 = vld [vmem:[%s408_s28 + $0x18] sm:$0xff]  ;;  %1039 = vmatprep.subr.bf16.mxu1 %v1093_v11  ;;  %1017 = vmatprep.subr.bf16.mxu0 %v1093_v11 }
  0x31   : > { %v473_v7 = vmax.f32 %v1288_v3, %v469_v5 }
  0x32   : > { %471 = vmax.xlane.f32.xlu0 %v470_v4  ;;  %v732_v4 = vld [vmem:[%s1277_s11] sm:$0xff] }
  0x33   : > { %1040 = vmatpush3.bf16.msra.mxu1 %v1094_v12  ;;  %1018 = vmatpush3.bf16.msra.mxu0 %v1094_v12 }
  0x34   : > { %1041 = vmatprep.subr.bf16.mxu1 %v1095_v13  ;;  %1019 = vmatprep.subr.bf16.mxu0 %v1095_v13 }
  0x36   : > { %474 = vmax.xlane.f32.xlu0 %v473_v7 }
  0x37   : > { %1042 = vmatpush3.bf16.msra.mxu1 %v1096_v14  ;;  %1020 = vmatpush3.bf16.msra.mxu0 %v1096_v14 }
  0x38   : > { %1043 = vmatprep.subr.bf16.mxu1 %v1097_v15  ;;  %1021 = vmatprep.subr.bf16.mxu0 %v1097_v15 }
  0x3b   : > { %1044 = vmatpush3.bf16.msra.mxu1 %v1098_v16  ;;  %1022 = vmatpush3.bf16.msra.mxu0 %v1098_v16 }
  0x3c   : > { %1045 = vmatprep.subr.bf16.mxu1 %v1099_v17  ;;  %1023 = vmatprep.subr.bf16.mxu0 %v1099_v17 }
  0x3f   : > { %1046 = vmatpush3.bf16.msra.mxu1 %v1100_v18  ;;  %1024 = vmatpush3.bf16.msra.mxu0 %v1100_v18 }
  0x40   : > { %1047 = vmatprep.subr.bf16.mxu1 %v1101_v19  ;;  %1025 = vmatprep.subr.bf16.mxu0 %v1101_v19 }
  0x43   : > { %1048 = vmatpush3.bf16.msra.mxu1 %v1102_v20  ;;  %1026 = vmatpush3.bf16.msra.mxu0 %v1102_v20 }
  0x44   : > { %1049 = vmatprep.subr.bf16.mxu1 %v1103_v21  ;;  %1027 = vmatprep.subr.bf16.mxu0 %v1103_v21 }
  0x47   : > { %1050 = vmatpush3.bf16.msra.mxu1 %v1104_v22  ;;  %1028 = vmatpush3.bf16.msra.mxu0 %v1104_v22  ;;  %v1180_v22 = vmov 0.0  }
  0x4c   : > { %736 = vperm.xlu0 %1087, %v730_v49  }
  0xbf   : > { %v472_v23 = vpop.xlane.xlu0 %471 }
  0xc0   : > { %v476_v24 = vsub.f32 %v466_v1, %v472_v23  ;;  %v477_v25 = vsub.f32 %v467_v2, %v472_v23 }
  0xc2   : > { %v480_v26 = vmul.f32 1.442695, %v476_v24  ;;  %v482_v27 = vmul.f32 1.442695, %v477_v25 }
  0xc3   : > { %v475_v28 = vpop.xlane.xlu0 %474 }
  0xc4   : > { %v478_v29 = vsub.f32 %v1288_v3, %v475_v28  ;;  %v479_v30 = vsub.f32 %v469_v5, %v475_v28  ;;  %1105 = vpow2.f32 %v480_v26  ;;  %v731_v3 = vld [vmem:[%s1272_s30 + $0x8] sm:$0xff]  ;;  %s726_s30 = scalar_lea.vmem %s416_s22, %s465_s10 }
  0xc5   : > { %1107 = vpow2.f32 %v482_v27  ;;  %v733_v5 = vld [vmem:[%s1277_s11 + $0x8] sm:$0xff]  ;;  %s728_s11 = scalar_lea.vmem %s419_s25, %s465_s10  ;;  %v1004_v16 = vld [vmem:[%s726_s30] ss:$0 sm:$0xff] }
  0xc6   : > { %v484_v31 = vmul.f32 1.442695, %v478_v29  ;;  %v486_v32 = vmul.f32 1.442695, %v479_v30  ;;  %v1005_v17 = vld [vmem:[%s728_s11] ss:$0 sm:$0xff] }
  0xc8   : > { %1109 = vpow2.f32 %v484_v31 }
  0xc9   : > { %1111 = vpow2.f32 %v486_v32 }
  0xcb   : > { %v737_v12 = vpop.permute.xlu0 %736 }
  0xce   : > { %v1106_v33 = vpop.eup %1105 }
  0xcf   : > { %v1108_v34 = vpop.eup %1107 }
  0xd2   : > { %v1110_v35 = vpop.eup %1109 }
  0xd3   : > { %v1112_v36 = vpop.eup %1111  ;;  %v520_v37 = vpack.c.bf16 %v1110_v35, %v1106_v33 }
  0xd4   : > { %v521_v38 = vpack.c.bf16 %v1112_v36, %v1108_v34 }
  0xd5   : > { %v522_v39 = vunpack.c.l.bf16 %v520_v37  ;;  %v524_v40 = vunpack.c.h.bf16 %v520_v37 }
  0xd6   : > { %701 = vmatprep.mubr.bf16.mxu1 %v521_v38  ;;  %v523_v41 = vunpack.c.l.bf16 %v521_v38  ;;  %v525_v42 = vunpack.c.h.bf16 %v521_v38 }
  0xd7   : > { %702 = vmatmul.mubr.bf16.vlgmr.msra.gmra.mrb[0].mxu1 %v520_v37  ;;  %v526_v43 = vsub.f32 %v1106_v33, %v522_v39  ;;  %v528_v44 = vsub.f32 %v1110_v35, %v524_v40  ;;  %v788_v39 = vld [vmem:[#allocation2] sm:$0xff] }
  0xd8   : > { %v527_v45 = vsub.f32 %v1108_v34, %v523_v41  ;;  %v529_v46 = vsub.f32 %v1112_v36, %v525_v42  ;;  %v789_v42 = vld [vmem:[#allocation2 + $0x8] sm:$0xff] }
  0xd9   : > { %v530_v47 = vpack.c.bf16 %v528_v44, %v526_v43 }
  0xda   : > { %v531_v48 = vpack.c.bf16 %v529_v46, %v527_v45 }
  0xdc   : > { %660 = vmatprep.mubr.bf16.mxu0 %v531_v48 }
  0xdd   : > { %661 = vmatmul.mubr.bf16.vlgmr.msra.gmra.mrb[0].mxu0 %v530_v47 }
 0x1aa   : > { %v1051_v51 = vpop.f32.mrb[0].mxu1 }
 0x1ab   : > { %v1052_v52 = vpop.f32.mrb[1].mxu1 }
 0x1ac   : > { %v1053_v53 = vadd.f32 %v1052_v52, %v1051_v51  ;;  %v1054_v54 = vpop.f32.mrb[2].mxu1 }
 0x1ad   : > { %v1055_v55 = vpop.f32.mrb[3].mxu1 }
 0x1ae   : > { %v1056_v56 = vadd.f32 %v1055_v55, %v1054_v54 }
 0x1b0   : > { %v1029_v57 = vpop.f32.mrb[0].mxu0 }
 0x1b1   : > { %v1030_v58 = vpop.f32.mrb[1].mxu0 }
 0x1b2   : > { %v1031_v59 = vadd.f32 %v1030_v58, %v1029_v57  ;;  %v1032_v60 = vpop.f32.mrb[2].mxu0 }
 0x1b3   : > { %v1033_v61 = vpop.f32.mrb[3].mxu0 }
 0x1b4   : > { %v704_v62 = vadd.f32 %v1053_v53, %v1031_v59  ;;  %v1034_v63 = vadd.f32 %v1033_v61, %v1032_v60 }
 0x1b6   : > { %v707_v0 = vadd.f32 %v1056_v56, %v1034_v63  ;;  %v710_v1 = vmax.f32 %v704_v62, 1e-30 }
 0x1b8   : > { %714 = vrot.lane.b32.xlu1 %v710_v1, %s1179_s18  ;;  %v711_v2 = vmax.f32 %v707_v0, 1e-30 }
 0x1bc   : > { %716 = vrot.lane.b32.xlu1 %v711_v2, %s1179_s18 }
 0x1c0   : > { %741 = vperm.xlu1 %1088, %v731_v3  }
 0x1c4   : > { %756 = vperm.xlu1 %1088, %v732_v4  }
 0x1c8   : > { %761 = vperm.xlu1 %1088, %v733_v5  }
 0x22a   : > { %v715_v6 = vpop.permute.xlu1 %714 }
 0x22b   : > { %1113 = vrcp.f32 %v715_v6 }
 0x22e   : > { %v717_v7 = vpop.permute.xlu1 %716 }
 0x22f   : > { %1115 = vrcp.f32 %v717_v7 }
 0x235   : > { %v1114_v8 = vpop.eup %1113 }
 0x236   : > { %v721_v9 = vmul.f32 %v1114_v8, %v704_v62 }
 0x238   : > { %v724_v11 = vmin.f32 %v721_v9, 0.999999 }
 0x239   : > { %v1116_v10 = vpop.eup %1115 }
 0x23a   : > { %v723_v13 = vmul.f32 %v1116_v10, %v707_v0  ;;  %v744_v15 = vmul.f32 %v737_v12, %v724_v11 }
 0x23c   : > { %v725_v18 = vmin.f32 %v723_v13, 0.999999  ;;  %v752_v20 = vmul.f32 %v1004_v16, %v744_v15 }
 0x23f   : > { %v742_v14 = vpop.permute.xlu1 %741 }
 0x240   : > { %v745_v21 = vmul.f32 %v742_v14, %v725_v18 }
 0x242   : > { %v753_v26 = vmul.f32 %v1004_v16, %v745_v21 }
 0x243   : > { %v757_v19 = vpop.permute.xlu1 %756 }
 0x244   : > { %vm770_vm1 = vcmp.ne.f32.partialorder %v757_v19, %v1005_v17 }
 0x245   : > { %v1006_v23 = vsel %vm770_vm1, 1.0, %v1180_v22 }
 0x246   : > { %v776_v24 = vmul.f32 %v1006_v23, %v752_v20 }
 0x247   : > { %v762_v25 = vpop.permute.xlu1 %761 }
 0x248   : > { %v780_v27 = vsub.f32 1.0, %v776_v24  ;;  %vm771_vm2 = vcmp.ne.f32.partialorder %v762_v25, %v1005_v17  ;;  %vm778_vm4 = vcmp.gt.f32.partialorder %v776_v24, 0.15 }
 0x249   : > { %v1007_v28 = vsel %vm771_vm2, 1.0, %v1180_v22 }
 0x24a   : > { %1117 = vlog2.f32 %v780_v27  ;;  %v777_v29 = vmul.f32 %v1007_v28, %v753_v26 }
 0x24c   : > { %v781_v30 = vsub.f32 1.0, %v777_v29  ;;  %vm779_vm5 = vcmp.gt.f32.partialorder %v777_v29, 0.15 }
 0x24e   : > { %1119 = vlog2.f32 %v781_v30 }
 0x254   : > { %v1118_v31 = vpop.eup %1117 }
 0x255   : > { %v783_v32 = vmul.f32 0.6931472, %v1118_v31 }
 0x257   : > { %v786_v33 = vsel %vm778_vm4, %v783_v32, 0.0 }
 0x258   : > { %v1120_v34 = vpop.eup %1119  ;;  %v791_v35 = vsel %vm790_vm3, %v786_v33, 0.0 }
 0x259   : > { %792 = vadd.xlane.f32.xlu1 %v791_v35  ;;  %v785_v36 = vmul.f32 0.6931472, %v1120_v34 }
 0x25b   : > { %v787_v37 = vsel %vm779_vm5, %v785_v36, 0.0 }
 0x25c   : > { %v794_v38 = vsel %vm790_vm3, %v787_v37, 0.0 }
 0x25d   : > { %795 = vadd.xlane.f32.xlu0 %v794_v38 }
 0x2e6   : > { %v793_v40 = vpop.xlane.xlu1 %792 }
 0x2e7   : > { %v797_v41 = vadd.f32 %v793_v40, %v788_v39 }
 0x2e9   : > { %800 = vst.msk [vmem:[#allocation2] sm:$0xff] %vm455_vm0, %v797_v41 }
 0x2ea   : > { %v796_v43 = vpop.xlane.xlu0 %795 }
 0x2eb   : > { %v798_v44 = vadd.f32 %v796_v43, %v789_v42 }
 0x2ed   : > { %801 = vst.msk [vmem:[#allocation2 + $0x8] sm:$0xff] %vm455_vm0, %v798_v44 }
 0x2ee PF:  {}
 0x2f0   : > { %v805_v45 = vld [vmem:[#allocation2] sm:$0xff] }
 0x2f1   : > { %v807_v47 = vmul.f32 1.442695, %v805_v45 }
 0x2f3   : > { %1121 = vpow2.f32 %v807_v47 }
 0x2f4   : > { %v806_v46 = vld [vmem:[#allocation2 + $0x8] sm:$0xff] }
 0x2f5   : > { %v809_v48 = vmul.f32 1.442695, %v806_v46 }
 0x2f7   : > { %1123 = vpow2.f32 %v809_v48 }
 0x2fd   : > { %v1122_v49 = vpop.eup %1121 }
 0x2fe   : > { %v811_v51 = vsub.f32 1.0, %v1122_v49 }
 0x300   : > { %vm813_vm6 = vcmp.gt.f32.partialorder %v811_v51, 0.15 }
 0x301   : > { %v1124_v50 = vpop.eup %1123  ;;  %v815_v53 = vsel %vm813_vm6, %v811_v51, 0.0 }
 0x302   : > { %v812_v52 = vsub.f32 1.0, %v1124_v50  ;;  %818 = vst.msk [vmem:[%s1283_s20] sm:$0xff] %vm455_vm0, %v815_v53 }
 0x304   : > { %vm814_vm7 = vcmp.gt.f32.partialorder %v812_v52, 0.15 }
 0x305   : > { %v816_v54 = vsel %vm814_vm7, %v812_v52, 0.0 }
 0x306   : > { %819 = vst.msk [vmem:[%s1283_s20 + $0x8] sm:$0xff] %vm455_vm0, %v816_v54 }
 0x307 PF: > { %s28_s15 = sadd.s32 1, %s1173_s15   ;;  %s1379_s1 = smov %s1169_s14 }
 0x308   : > { %p25_p3 = scmp.ge.s32.totalorder %s28_s15, 4   ;;  %s1380_s14 = smov %s1382_s16 }
 0x30a   :  { %27 = sbr.rel (!%p25_p3) target bundleno = 27 (0x1b), region = 100 }

</bundles_post_ra>
